<compile_context>
chip_gen: v7x
topology: tpu7x:2x2x1
jax: 0.10.0
libtpu: 0.0.40
codegen_flags: <defaults>
</compile_context>

<pallas_src>
import numpy as np
import jax
import jax.numpy as jnp
from jax import lax
from jax.experimental import pallas as pl
from jax.experimental.pallas import tpu as pltpu

EPS = 1e-5  # nn.BatchNorm2d default eps


def _round_up(x, m):
    return (x + m - 1) // m * m


def branch1_forward(x_nchw, params):
    """x_nchw: (N, Cin, H, W) float32. Returns (N, Cout, H, W) float32."""
    w, _cb, g, b = params  # conv bias is exactly cancelled by training-mode BN
    N, Cin, H, W = x_nchw.shape
    Cout = w.shape[0]
    Hp, Wp = H + 2, W + 2
    img = Hp * Wp                     # flattened padded image length
    count = N * H * W                 # BN population size (valid pixels)

    # Extended-output width: covers the last image's valid window, lane-dense.
    QP = _round_up((N - 1) * img + H * Wp, 128)
    # Flat input length: the largest tap offset (2*Wp + 2) past the last read.
    Lp = _round_up(QP + 2 * Wp + 2, 128)
    offsets = [ky * Wp + kx for ky in range(3) for kx in range(3)]

    # ---- glue on the *unexpanded* input only: channel-major + zero pad -----
    xc = jnp.transpose(x_nchw, (1, 0, 2, 3)).astype(jnp.float32)   # (Cin,N,H,W)
    xp = jnp.pad(xc, ((0, 0), (0, 0), (1, 1), (1, 1)))             # (Cin,N,Hp,Wp)
    xflat = jnp.pad(xp.reshape(Cin, N * img),
                    ((0, 0), (0, Lp - N * img)))                   # (Cin, Lp)

    # Weights OIHW -> (Cout, 9*Cin), tap-major then Cin (matches patch rows).
    wt = jnp.transpose(w, (0, 2, 3, 1)).reshape(Cout, 9 * Cin).astype(jnp.float32)
    gb = jnp.stack([g, b], axis=1).astype(jnp.float32)             # (Cout, 2)

    # Valid-column mask for BN stats (junk columns at row / image boundaries).
    q = np.arange(QP)
    rem = q % img
    valid = (q // img < N) & (rem // Wp < H) & (rem % Wp < W)
    mask = jnp.asarray(valid.astype(np.float32)).reshape(1, QP)    # (1, QP)

    def kernel(x_ref, wt_ref, gb_ref, mask_ref, out_ref, patches_ref):
        # In-kernel im2col: each 3x3 tap is one contiguous lane window of the
        # flattened padded input (static 9-iteration Python loop).
        for t, off in enumerate(offsets):
            patches_ref[t * Cin:(t + 1) * Cin, :] = x_ref[:, off:off + QP]

        # conv3x3 as a single K = 9*Cin MXU matmul, f32 accumulate.
        y = jnp.dot(wt_ref[...], patches_ref[...],
                    preferred_element_type=jnp.float32)            # (Cout, QP)

        # BatchNorm2d, training mode: masked per-channel batch stats
        # (lane reductions on the XLU), biased variance.
        m = mask_ref[...]                                          # (1, QP)
        inv_cnt = 1.0 / float(count)
        mu = jnp.sum(y * m, axis=1, keepdims=True) * inv_cnt       # (Cout, 1)
        yc = y - mu
        var = jnp.sum(yc * yc * m, axis=1, keepdims=True) * inv_cnt

        gbv = gb_ref[...]                                          # (Cout, 2)
        scale = gbv[:, 0:1] * lax.rsqrt(var + EPS)                 # (Cout, 1)
        shift = gbv[:, 1:2]

        # Single fused scale/shift pass, lane-dense unmasked store.
        out_ref[...] = (yc * scale + shift).astype(out_ref.dtype)

    def full(shape):
        nd = len(shape)
        return pl.BlockSpec(shape, lambda i, _nd=nd: (0,) * _nd)

    flops = 2 * Cout * 9 * Cin * QP
    bytes_accessed = 4 * (Cin * Lp + Cout * 9 * Cin + Cout * 2 + QP + Cout * QP)

    out_ext = pl.pallas_call(
        kernel,
        out_shape=jax.ShapeDtypeStruct((Cout, QP), jnp.float32),
        grid=(1,),
        in_specs=[full((Cin, Lp)), full((Cout, 9 * Cin)),
                  full((Cout, 2)), full((1, QP))],
        out_specs=full((Cout, QP)),
        scratch_shapes=[pltpu.VMEM((9 * Cin, QP), jnp.float32)],
        compiler_params=pltpu.CompilerParams(
            dimension_semantics=("arbitrary",)),
        cost_estimate=pl.CostEstimate(flops=flops, transcendentals=Cout,
                                      bytes_accessed=bytes_accessed),
    )(xflat, wt, gb, mask)

    # Drop the junk columns: per image, view (H, Wp) and keep the first W cols.
    imgs = [out_ext[:, n * img:n * img + H * Wp].reshape(Cout, H, Wp)[:, :, :W]
            for n in range(N)]
    return jnp.stack(imgs, axis=0)                                 # (N,Cout,H,W)


def branch1_reference(x, params):
    """Pure-JAX reference (NCHW), mirrors PyTorch training-mode forward."""
    w, cb, g, b = params
    dn = ('NCHW', 'OIHW', 'NCHW')
    y = lax.conv_general_dilated(x, w, (1, 1), ((1, 1), (1, 1)),
                                 dimension_numbers=dn,
                                 precision=lax.Precision.HIGHEST)
    y = y + cb.reshape(1, -1, 1, 1)
    mu = jnp.mean(y, axis=(0, 2, 3), keepdims=True)
    var = jnp.mean((y - mu) ** 2, axis=(0, 2, 3), keepdims=True)
    return ((y - mu) * lax.rsqrt(var + EPS) * g.reshape(1, -1, 1, 1)
            + b.reshape(1, -1, 1, 1))


if __name__ == "__main__":
    N, Cin, Cout, H, W = 2, 4, 8, 16, 16
    ks = jax.random.split(jax.random.PRNGKey(0), 5)

    x = jax.random.normal(ks[0], (N, Cin, H, W), jnp.float32)
    w = 0.2 * jax.random.normal(ks[1], (Cout, Cin, 3, 3), jnp.float32)
    cb = 0.1 * jax.random.normal(ks[2], (Cout,), jnp.float32)
    g = 1.0 + 0.1 * jax.random.normal(ks[3], (Cout,), jnp.float32)
    b = 0.1 * jax.random.normal(ks[4], (Cout,), jnp.float32)
    params = (w, cb, g, b)

    out = jax.block_until_ready(branch1_forward(x, params))
    ref = jax.block_until_ready(branch1_reference(x, params))

    assert out.shape == (N, Cout, H, W), out.shape
    err = float(jnp.max(jnp.abs(out - ref)))
    if err > 5e-3:
        raise AssertionError(f"mismatch vs reference: max abs err {err}")
    print("KERNEL_OK")
</pallas_src>

<mosaic_0001>
module attributes {stable_mosaic.version = 11 : i64} {
  func.func @kernel(%arg0: i32, %arg1: memref<4x768xf32, #tpu.memory_space<vmem>>, %arg2: memref<8x36xf32, #tpu.memory_space<vmem>>, %arg3: memref<8x2xf32, #tpu.memory_space<vmem>>, %arg4: memref<1x640xf32, #tpu.memory_space<vmem>>, %arg5: memref<8x640xf32, #tpu.memory_space<vmem>>, %arg6: memref<36x640xf32, #tpu.memory_space<vmem>>) attributes {dimension_semantics = [#tpu.dimension_semantics<arbitrary>], iteration_bounds = array<i64: 1>, scalar_prefetch = 0 : i64, scratch_operands = 1 : i64, tpu.core_type = #tpu.core_type<tc>, window_params = [{pipeline_mode = #tpu.pipeline_mode<synchronous>, transform_indices = @transform_0, window_bounds = array<i64: 4, 768>}, {pipeline_mode = #tpu.pipeline_mode<synchronous>, transform_indices = @transform_1, window_bounds = array<i64: 8, 36>}, {pipeline_mode = #tpu.pipeline_mode<synchronous>, transform_indices = @transform_2, window_bounds = array<i64: 8, 2>}, {pipeline_mode = #tpu.pipeline_mode<synchronous>, transform_indices = @transform_3, window_bounds = array<i64: 1, 640>}, {pipeline_mode = #tpu.pipeline_mode<synchronous>, transform_indices = @transform_4, window_bounds = array<i64: 8, 640>}]} {
    %c0 = arith.constant 0 : index
    %c0_0 = arith.constant 0 : index
    %0 = vector.load %arg1[%c0, %c0_0] : memref<4x768xf32, #tpu.memory_space<vmem>>, vector<4x640xf32>
    %c0_1 = arith.constant 0 : index
    %c0_2 = arith.constant 0 : index
    %1 = vector.load %arg6[%c0_1, %c0_2] : memref<36x640xf32, #tpu.memory_space<vmem>>, vector<4x640xf32>
    tpu.vector_store %arg6[%c0_1, %c0_2], %0 {strides = array<i32>} : memref<36x640xf32, #tpu.memory_space<vmem>>, vector<4x640xf32>,
    %c0_3 = arith.constant 0 : index
    %c1 = arith.constant 1 : index
    %2 = vector.load %arg1[%c0_3, %c1] : memref<4x768xf32, #tpu.memory_space<vmem>>, vector<4x640xf32>
    %c4 = arith.constant 4 : index
    %c0_4 = arith.constant 0 : index
    %3 = vector.load %arg6[%c4, %c0_4] : memref<36x640xf32, #tpu.memory_space<vmem>>, vector<4x640xf32>
    tpu.vector_store %arg6[%c4, %c0_4], %2 {strides = array<i32>} : memref<36x640xf32, #tpu.memory_space<vmem>>, vector<4x640xf32>,
    %c0_5 = arith.constant 0 : index
    %c2 = arith.constant 2 : index
    %4 = vector.load %arg1[%c0_5, %c2] : memref<4x768xf32, #tpu.memory_space<vmem>>, vector<4x640xf32>
    %c8 = arith.constant 8 : index
    %c0_6 = arith.constant 0 : index
    %5 = vector.load %arg6[%c8, %c0_6] : memref<36x640xf32, #tpu.memory_space<vmem>>, vector<4x640xf32>
    tpu.vector_store %arg6[%c8, %c0_6], %4 {strides = array<i32>} : memref<36x640xf32, #tpu.memory_space<vmem>>, vector<4x640xf32>,
    %c0_7 = arith.constant 0 : index
    %c18 = arith.constant 18 : index
    %6 = vector.load %arg1[%c0_7, %c18] : memref<4x768xf32, #tpu.memory_space<vmem>>, vector<4x640xf32>
    %c12 = arith.constant 12 : index
    %c0_8 = arith.constant 0 : index
    %7 = vector.load %arg6[%c12, %c0_8] : memref<36x640xf32, #tpu.memory_space<vmem>>, vector<4x640xf32>
    tpu.vector_store %arg6[%c12, %c0_8], %6 {strides = array<i32>} : memref<36x640xf32, #tpu.memory_space<vmem>>, vector<4x640xf32>,
    %c0_9 = arith.constant 0 : index
    %c19 = arith.constant 19 : index
    %8 = vector.load %arg1[%c0_9, %c19] : memref<4x768xf32, #tpu.memory_space<vmem>>, vector<4x640xf32>
    %c16 = arith.constant 16 : index
    %c0_10 = arith.constant 0 : index
    %9 = vector.load %arg6[%c16, %c0_10] : memref<36x640xf32, #tpu.memory_space<vmem>>, vector<4x640xf32>
    tpu.vector_store %arg6[%c16, %c0_10], %8 {strides = array<i32>} : memref<36x640xf32, #tpu.memory_space<vmem>>, vector<4x640xf32>,
    %c0_11 = arith.constant 0 : index
    %c20 = arith.constant 20 : index
    %10 = vector.load %arg1[%c0_11, %c20] : memref<4x768xf32, #tpu.memory_space<vmem>>, vector<4x640xf32>
    %c20_12 = arith.constant 20 : index
    %c0_13 = arith.constant 0 : index
    %11 = vector.load %arg6[%c20_12, %c0_13] : memref<36x640xf32, #tpu.memory_space<vmem>>, vector<4x640xf32>
    tpu.vector_store %arg6[%c20_12, %c0_13], %10 {strides = array<i32>} : memref<36x640xf32, #tpu.memory_space<vmem>>, vector<4x640xf32>,
    %c0_14 = arith.constant 0 : index
    %c36 = arith.constant 36 : index
    %12 = vector.load %arg1[%c0_14, %c36] : memref<4x768xf32, #tpu.memory_space<vmem>>, vector<4x640xf32>
    %c24 = arith.constant 24 : index
    %c0_15 = arith.constant 0 : index
    %13 = vector.load %arg6[%c24, %c0_15] : memref<36x640xf32, #tpu.memory_space<vmem>>, vector<4x640xf32>
    tpu.vector_store %arg6[%c24, %c0_15], %12 {strides = array<i32>} : memref<36x640xf32, #tpu.memory_space<vmem>>, vector<4x640xf32>,
    %c0_16 = arith.constant 0 : index
    %c37 = arith.constant 37 : index
    %14 = vector.load %arg1[%c0_16, %c37] : memref<4x768xf32, #tpu.memory_space<vmem>>, vector<4x640xf32>
    %c28 = arith.constant 28 : index
    %c0_17 = arith.constant 0 : index
    %15 = vector.load %arg6[%c28, %c0_17] : memref<36x640xf32, #tpu.memory_space<vmem>>, vector<4x640xf32>
    tpu.vector_store %arg6[%c28, %c0_17], %14 {strides = array<i32>} : memref<36x640xf32, #tpu.memory_space<vmem>>, vector<4x640xf32>,
    %c0_18 = arith.constant 0 : index
    %c38 = arith.constant 38 : index
    %16 = vector.load %arg1[%c0_18, %c38] : memref<4x768xf32, #tpu.memory_space<vmem>>, vector<4x640xf32>
    %c32 = arith.constant 32 : index
    %c0_19 = arith.constant 0 : index
    %17 = vector.load %arg6[%c32, %c0_19] : memref<36x640xf32, #tpu.memory_space<vmem>>, vector<4x640xf32>
    tpu.vector_store %arg6[%c32, %c0_19], %16 {strides = array<i32>} : memref<36x640xf32, #tpu.memory_space<vmem>>, vector<4x640xf32>,
    %c0_20 = arith.constant 0 : index
    %c0_21 = arith.constant 0 : index
    %18 = vector.load %arg2[%c0_20, %c0_21] : memref<8x36xf32, #tpu.memory_space<vmem>>, vector<8x36xf32>
    %c0_22 = arith.constant 0 : index
    %c0_23 = arith.constant 0 : index
    %19 = vector.load %arg6[%c0_22, %c0_23] : memref<36x640xf32, #tpu.memory_space<vmem>>, vector<36x640xf32>
    %cst = arith.constant dense<0.000000e+00> : vector<8x640xf32>
    %20 = tpu.matmul %18, %19, %cst {dimension_numbers = #tpu.dot_dimension_numbers<[1], [0], [0], [1], [0, 0, 1, 1], [], []>} : vector<8x36xf32>, vector<36x640xf32>, vector<8x640xf32> -> vector<8x640xf32>
    %c0_24 = arith.constant 0 : index
    %c0_25 = arith.constant 0 : index
    %21 = vector.load %arg4[%c0_24, %c0_25] : memref<1x640xf32, #tpu.memory_space<vmem>>, vector<1x640xf32>
    %22 = vector.broadcast %21 : vector<1x640xf32> to vector<8x640xf32>
    %23 = arith.mulf %20, %22 : vector<8x640xf32>
    %cst_26 = arith.constant dense<0.000000e+00> : vector<8xf32>
    %24 = vector.multi_reduction <add>, %23, %cst_26 [1] : vector<8x640xf32> to vector<8xf32>
    %25 = vector.shape_cast %24 : vector<8xf32> to vector<8x1xf32>
    %cst_27 = arith.constant 0.001953125 : f32
    %26 = vector.broadcast %cst_27 : f32 to vector<8x1xf32>
    %27 = arith.mulf %25, %26 : vector<8x1xf32>
    %28 = vector.broadcast %27 : vector<8x1xf32> to vector<8x640xf32>
    %29 = arith.subf %20, %28 : vector<8x640xf32>
    %30 = arith.mulf %29, %29 : vector<8x640xf32>
    %31 = vector.broadcast %21 : vector<1x640xf32> to vector<8x640xf32>
    %32 = arith.mulf %30, %31 : vector<8x640xf32>
    %cst_28 = arith.constant dense<0.000000e+00> : vector<8xf32>
    %33 = vector.multi_reduction <add>, %32, %cst_28 [1] : vector<8x640xf32> to vector<8xf32>
    %34 = vector.shape_cast %33 : vector<8xf32> to vector<8x1xf32>
    %cst_29 = arith.constant 0.001953125 : f32
    %35 = vector.broadcast %cst_29 : f32 to vector<8x1xf32>
    %36 = arith.mulf %34, %35 : vector<8x1xf32>
    %c0_30 = arith.constant 0 : index
    %c0_31 = arith.constant 0 : index
    %37 = vector.load %arg3[%c0_30, %c0_31] : memref<8x2xf32, #tpu.memory_space<vmem>>, vector<8x2xf32>
    %38 = vector.extract_strided_slice %37 {offsets = [0, 0], sizes = [8, 1], strides = [1, 1]} : vector<8x2xf32> to vector<8x1xf32>
    %cst_32 = arith.constant 9.99999974E-6 : f32
    %39 = vector.broadcast %cst_32 : f32 to vector<8x1xf32>
    %40 = arith.addf %36, %39 : vector<8x1xf32>
    %41 = math.rsqrt %40 : vector<8x1xf32>
    %42 = arith.mulf %38, %41 : vector<8x1xf32>
    %43 = vector.extract_strided_slice %37 {offsets = [0, 1], sizes = [8, 1], strides = [1, 1]} : vector<8x2xf32> to vector<8x1xf32>
    %44 = vector.broadcast %42 : vector<8x1xf32> to vector<8x640xf32>
    %45 = arith.mulf %29, %44 : vector<8x640xf32>
    %46 = vector.broadcast %43 : vector<8x1xf32> to vector<8x640xf32>
    %47 = arith.addf %45, %46 : vector<8x640xf32>
    %c0_33 = arith.constant 0 : index
    %c0_34 = arith.constant 0 : index
    %48 = vector.load %arg5[%c0_33, %c0_34] : memref<8x640xf32, #tpu.memory_space<vmem>>, vector<8x640xf32>
    tpu.vector_store %arg5[%c0_33, %c0_34], %47 {strides = array<i32>} : memref<8x640xf32, #tpu.memory_space<vmem>>, vector<8x640xf32>,
    return
  }
  func.func @transform_0(%arg0: i32) -> (i32, i32) {
    %c0_i32 = arith.constant 0 : i32
    %c0_i32_0 = arith.constant 0 : i32
    %c0_i32_1 = arith.constant 0 : i32
    return %c0_i32, %c0_i32_0 : i32, i32
  }
  func.func @transform_1(%arg0: i32) -> (i32, i32) {
    %c0_i32 = arith.constant 0 : i32
    %c0_i32_0 = arith.constant 0 : i32
    %c0_i32_1 = arith.constant 0 : i32
    return %c0_i32, %c0_i32_0 : i32, i32
  }
  func.func @transform_2(%arg0: i32) -> (i32, i32) {
    %c0_i32 = arith.constant 0 : i32
    %c0_i32_0 = arith.constant 0 : i32
    %c0_i32_1 = arith.constant 0 : i32
    return %c0_i32, %c0_i32_0 : i32, i32
  }
  func.func @transform_3(%arg0: i32) -> (i32, i32) {
    %c0_i32 = arith.constant 0 : i32
    %c0_i32_0 = arith.constant 0 : i32
    %c0_i32_1 = arith.constant 0 : i32
    return %c0_i32, %c0_i32_0 : i32, i32
  }
  func.func @transform_4(%arg0: i32) -> (i32, i32) {
    %c0_i32 = arith.constant 0 : i32
    %c0_i32_0 = arith.constant 0 : i32
    %c0_i32_1 = arith.constant 0 : i32
    return %c0_i32, %c0_i32_0 : i32, i32
  }
}

</mosaic_0001>

<bundles_post_ra>
// kernel: tpu_custom_call.1
= control target key start
LH: loop header
LB: loop body
LE: loop exit
PB: predicated region body
PF: predicated region fallthrough
CT: control target
= control target key end

     0   :  { %9 = vsyncpa [#allocation4], 0  ;;  %s1027_s0 = inlined_call_operand.hbm [shape: f32[4,768], index: 0, kind: input, shape index: {}]   ;;  %s1028_s1 = inlined_call_operand.vmem [shape: f32[8,36], index: 1, kind: input, shape index: {}]   ;;  %s1029_s2 = inlined_call_operand.vmem [shape: f32[8,2], index: 2, kind: input, shape index: {}]   ;;  %s1030_s3 = inlined_call_operand.vmem [shape: f32[1,640], index: 3, kind: input, shape index: {}]   ;;  %s1031_s4 = inlined_call_operand.hbm [shape: f32[8,640], index: 4, kind: output, shape index: {}]  }
   0x1   :  { %10 = vsyncpa [#allocation5], 0  ;;  %s826_s15 = smov [#allocation3]   ;;  %s778_s19 = scalar_lea.hbm %s1027_s0, 384 }
   0x2   :  { %s17_s16 = sshll.u32 %s826_s15, 4  ;;  %p779_p0 = scmp.ne.s32.totalorder %s1027_s0, %s778_s19  ;;  %s18_s16 = int_to_ptr.vmem [resolvable:$true] %s17_s16 }
   0x3   :  { %p782_p1 = scmp.lt.u32.totalorder %s778_s19, %s1027_s0 }
   0x5   :  { %p784_p2 = pnand %p782_p1, %p779_p0 }
   0x7   :  { %787 = shalt.err (!%p784_p2)
}
   0x8   :  { %s788_s24 = scalar_lea.vmem %s18_s16, 384  ;;  %p793_p4 = scmp.lt.s32.totalorder %s18_s16, %s18_s16 }
   0x9   :  { %p789_p3 = scmp.ne.s32.totalorder %s18_s16, %s788_s24  ;;  %p794_p5 = scmp.lt.s32.totalorder %s788_s24, %s788_s24 }
   0xb   :  { %p795_p6 = por %p794_p5, %p793_p4 }
   0xd   :  { %p796_p7 = pnand %p795_p6, %p789_p3 }
   0xf   :  { %799 = shalt.err (!%p796_p7)
}
  0x10   :  { %20 = dma.hbm_to_vmem [thread:$0]  %s1027_s0, 384, %s18_s16, [#allocation4]  }
  0x11   :  { %822 = dma.done.wait [#allocation4], 384  }
  0x12   :  { %823 = vsyncadd [#allocation4], 4294966912  ;;  %v82_v0 = vld [vmem:[#allocation3 + $0x8] sm:$0xff]  ;;  %v878_v1 = vld [vmem:[#allocation3] sm:$0xff]  ;;  %s827_s27 = smov 126   ;;  %s828_s28 = smov 127  }
  0x13   :  { %94 = vrot.lane.b32.xlu1 %v82_v0, %s827_s27  ;;  %v881_v2 = vcombine.high %v82_v0, %v82_v0  ;;  %55 = vrot.lane.b32.xlu0 %v878_v1, %s828_s28  ;;  %v87_v3 = vcombine.high %v878_v1, %v878_v1  ;;  %39 = vst [vmem:[#allocation2] sm:$0xf] %v878_v1  ;;  %41 = vst [vmem:[#allocation2 + $0x10] sm:$0xf] %v82_v0  ;;  %s829_s0 = smov 110   ;;  %s830_s29 = smov 109  }
  0x14   :  { %v125_v4 = vcombine.low %v82_v0, %v82_v0  ;;  %v50_v5 = vcombine.low %v878_v1, %v878_v1  ;;  %s831_s30 = smov 108   ;;  %s832_s5 = smov 92   ;;  %v46_v6 = vld [vmem:[#allocation3 + $0x10] sm:$0xff]  ;;  %v835_v10 = vmov 0.0   ;;  %vm102_vm0 = vcmask 1031168  }
  0x15   :  { %40 = vst [vmem:[#allocation2 + $0x8] sm:$0xf] %v87_v3  ;;  %42 = vst [vmem:[#allocation2 + $0x18] sm:$0xf] %v881_v2  ;;  %s833_s6 = smov 91   ;;  %v52_v7 = vcombine.low %v46_v6, %v46_v6  ;;  %s834_s7 = smov 90   ;;  %v89_v9 = vcombine.high %v46_v6, %v46_v6  ;;  %450 = vmatprep.mubr.f32.mxu0 %v835_v10  ;;  %521 = vmatprep.mubr.f32.mxu1 %v835_v10 }
  0x16   :  { %v32_v8 = vld [vmem:[#allocation3 + $0x10] sm:$0xf]  ;;  %vm139_vm1 = vcmask 900096   ;;  %vm65_vm2 = vcmask 1039360   ;;  %vm176_vm3 = vcmask 891904   ;;  %vm213_vm4 = vcmask 883712  }
  0x17   :  { %92 = vrot.lane.b32.xlu1 %v87_v3, %s827_s27  ;;  %129 = vrot.lane.b32.xlu0 %v878_v1, %s829_s0  ;;  %43 = vst [vmem:[#allocation2 + $0x20] sm:$0xf] %v32_v8  ;;  %vm250_vm5 = vcmask 752640   ;;  %vm287_vm6 = vcmask 744448   ;;  %vm324_vm7 = vcmask 736256   ;;  %vm370_vm8 = vcmask 1043456  }
  0x18   :  { %vm366_vm9 = vcmask 293888   ;;  %vm837_vm10 = vmmov 0   ;;  %s840_s12 = smov [#allocation6]  }
  0x19   :  { %s694_s13 = sshll.u32 %s840_s12, 4  ;;  %s695_s13 = int_to_ptr.vmem [resolvable:$true] %s694_s13 }
  0x1a   :  { %p805_p9 = scmp.lt.s32.totalorder %s695_s13, %s695_s13 }
  0x1b   :  { %131 = vrot.lane.b32.xlu1 %v125_v4, %s829_s0  ;;  %57 = vrot.lane.b32.xlu0 %v125_v4, %s828_s28 }
  0x1f   :  { %90 = vrot.lane.b32.xlu1 %v878_v1, %s827_s27  ;;  %53 = vrot.lane.b32.xlu0 %v50_v5, %s828_s28 }
  0x23   :  { %166 = vrot.lane.b32.xlu1 %v87_v3, %s830_s29  ;;  %127 = vrot.lane.b32.xlu0 %v50_v5, %s829_s0 }
  0x27   :  { %203 = vrot.lane.b32.xlu1 %v878_v1, %s831_s30  ;;  %168 = vrot.lane.b32.xlu0 %v82_v0, %s830_s29 }
  0x2b   :  { %240 = vrot.lane.b32.xlu1 %v87_v3, %s832_s5  ;;  %205 = vrot.lane.b32.xlu0 %v125_v4, %s831_s30 }
  0x2f   :  { %277 = vrot.lane.b32.xlu1 %v878_v1, %s833_s6  ;;  %242 = vrot.lane.b32.xlu0 %v82_v0, %s832_s5 }
  0x33   :  { %164 = vrot.lane.b32.xlu1 %v878_v1, %s830_s29  ;;  %279 = vrot.lane.b32.xlu0 %v125_v4, %s833_s6 }
  0x37   :  { %238 = vrot.lane.b32.xlu1 %v878_v1, %s832_s5  ;;  %201 = vrot.lane.b32.xlu0 %v50_v5, %s831_s30 }
  0x3b   :  { %59 = vrot.lane.b32.xlu1 %v82_v0, %s828_s28  ;;  %275 = vrot.lane.b32.xlu0 %v50_v5, %s833_s6 }
  0x3f   :  { %96 = vrot.lane.b32.xlu1 %v881_v2, %s827_s27  ;;  %61 = vrot.lane.b32.xlu0 %v52_v7, %s828_s28 }
  0x43   :  { %133 = vrot.lane.b32.xlu1 %v82_v0, %s829_s0  ;;  %98 = vrot.lane.b32.xlu0 %v46_v6, %s827_s27 }
  0x47   :  { %170 = vrot.lane.b32.xlu1 %v881_v2, %s830_s29  ;;  %135 = vrot.lane.b32.xlu0 %v52_v7, %s829_s0 }
  0x4b   :  { %207 = vrot.lane.b32.xlu1 %v82_v0, %s831_s30  ;;  %172 = vrot.lane.b32.xlu0 %v46_v6, %s830_s29 }
  0x4f   :  { %244 = vrot.lane.b32.xlu1 %v881_v2, %s832_s5  ;;  %209 = vrot.lane.b32.xlu0 %v52_v7, %s831_s30 }
  0x53   :  { %281 = vrot.lane.b32.xlu1 %v82_v0, %s833_s6  ;;  %246 = vrot.lane.b32.xlu0 %v46_v6, %s832_s5 }
  0x57   :  { %314 = vrot.lane.b32.xlu1 %v87_v3, %s834_s7  ;;  %283 = vrot.lane.b32.xlu0 %v52_v7, %s833_s6 }
  0x5b   :  { %63 = vrot.lane.b32.xlu1 %v46_v6, %s828_s28  ;;  %316 = vrot.lane.b32.xlu0 %v82_v0, %s834_s7 }
  0x5f   :  { %137 = vrot.lane.b32.xlu1 %v46_v6, %s829_s0  ;;  %100 = vrot.lane.b32.xlu0 %v89_v9, %s827_s27 }
  0x63   :  { %174 = vrot.lane.b32.xlu1 %v89_v9, %s830_s29  ;;  %312 = vrot.lane.b32.xlu0 %v878_v1, %s834_s7 }
  0x67   :  { %248 = vrot.lane.b32.xlu1 %v89_v9, %s832_s5  ;;  %211 = vrot.lane.b32.xlu0 %v46_v6, %s831_s30 }
  0x6b   :  { %318 = vrot.lane.b32.xlu1 %v881_v2, %s834_s7  ;;  %285 = vrot.lane.b32.xlu0 %v46_v6, %s833_s6 }
  0x6f   :  { %322 = vrot.lane.b32.xlu1 %v89_v9, %s834_s7  ;;  %320 = vrot.lane.b32.xlu0 %v46_v6, %s834_s7 }
  0x85   :  { %v944_v11 = vpop.permute.xlu1 %94  ;;  %v56_v12 = vpop.permute.xlu0 %55 }
  0x89   :  { %v93_v13 = vpop.permute.xlu1 %92  ;;  %v130_v14 = vpop.permute.xlu0 %129 }
  0x8a   :  { %v104_v15 = vsel %vm102_vm0, %v93_v13, %v944_v11 }
  0x8b   :  { %114 = vst [vmem:[#allocation2 + $0x30] sm:$0xf] %v104_v15 }
  0x8d   :  { %v948_v16 = vpop.permute.xlu1 %131  ;;  %v58_v17 = vpop.permute.xlu0 %57 }
  0x8e   :  { %v141_v18 = vsel %vm139_vm1, %v130_v14, %v948_v16  ;;  %v67_v19 = vsel %vm65_vm2, %v56_v12, %v58_v17 }
  0x8f   :  { %151 = vst [vmem:[#allocation2 + $0x30] sm:$0xf0] %v141_v18  ;;  %77 = vst [vmem:[#allocation2 + $0x8] sm:$0xf0] %v67_v19 }
  0x91   :  { %v91_v20 = vpop.permute.xlu1 %90  ;;  %v54_v21 = vpop.permute.xlu0 %53 }
  0x92   :  { %v103_v22 = vsel %vm102_vm0, %v91_v20, %v93_v13  ;;  %v66_v23 = vsel %vm65_vm2, %v54_v21, %v56_v12 }
  0x93   :  { %113 = vst [vmem:[#allocation2 + $0x28] sm:$0xf] %v103_v22  ;;  %76 = vst [vmem:[#allocation2] sm:$0xf0] %v66_v23 }
  0x95   :  { %v167_v24 = vpop.permute.xlu1 %166  ;;  %v128_v25 = vpop.permute.xlu0 %127 }
  0x96   :  { %v140_v26 = vsel %vm139_vm1, %v128_v25, %v130_v14  ;;  %v342_v27 = vld [vmem:[#allocation2 + $0x8] sm:$0xff]  ;;  %v347_v28 = vld [vmem:[#allocation2 + $0x30] sm:$0xff] }
  0x97   :  { %150 = vst [vmem:[#allocation2 + $0x28] sm:$0xf0] %v140_v26  ;;  %v730_v29 = vpack.c.bf16 %v347_v28, %v342_v27 }
  0x99   :  { %v204_v30 = vpop.permute.xlu1 %203  ;;  %v169_v31 = vpop.permute.xlu0 %168  ;;  %731 = vmatprep.subr.bf16.mxu0 %v730_v29 }
  0x9a   :  { %v178_v32 = vsel %vm176_vm3, %v167_v24, %v169_v31  ;;  %v341_v36 = vld [vmem:[#allocation2] sm:$0xff] }
  0x9b   :  { %188 = vst [vmem:[#allocation2 + $0x58] sm:$0xf] %v178_v32 }
  0x9d   :  { %v241_v33 = vpop.permute.xlu1 %240  ;;  %v206_v34 = vpop.permute.xlu0 %205 }
  0x9e   :  { %v215_v35 = vsel %vm213_vm4, %v204_v30, %v206_v34  ;;  %v346_v37 = vld [vmem:[#allocation2 + $0x28] sm:$0xff] }
  0x9f   :  { %225 = vst [vmem:[#allocation2 + $0x58] sm:$0xf0] %v215_v35  ;;  %v732_v38 = vpack.c.bf16 %v346_v37, %v341_v36 }
  0xa1   :  { %v278_v39 = vpop.permute.xlu1 %277  ;;  %v243_v40 = vpop.permute.xlu0 %242  ;;  %733 = vmatpush1.bf16.msra.mxu0 %v732_v38 }
  0xa2   :  { %v252_v41 = vsel %vm250_vm5, %v241_v33, %v243_v40 }
  0xa3   :  { %262 = vst [vmem:[#allocation2 + $0x80] sm:$0xf] %v252_v41 }
  0xa5   :  { %v165_v42 = vpop.permute.xlu1 %164  ;;  %v959_v43 = vpop.permute.xlu0 %279 }
  0xa6   :  { %v177_v44 = vsel %vm176_vm3, %v165_v42, %v167_v24  ;;  %v289_v45 = vsel %vm287_vm6, %v278_v39, %v959_v43  ;;  %v352_v54 = vld [vmem:[#allocation2 + $0x58] sm:$0xff] }
  0xa7   :  { %187 = vst [vmem:[#allocation2 + $0x50] sm:$0xf] %v177_v44  ;;  %299 = vst [vmem:[#allocation2 + $0x80] sm:$0xf0] %v289_v45 }
  0xa9   :  { %v239_v46 = vpop.permute.xlu1 %238  ;;  %v202_v47 = vpop.permute.xlu0 %201 }
  0xaa   :  { %v251_v48 = vsel %vm250_vm5, %v239_v46, %v241_v33  ;;  %v214_v49 = vsel %vm213_vm4, %v202_v47, %v204_v30 }
  0xab   :  { %261 = vst [vmem:[#allocation2 + $0x78] sm:$0xf] %v251_v48  ;;  %224 = vst [vmem:[#allocation2 + $0x50] sm:$0xf0] %v214_v49 }
  0xad   :  { %v60_v50 = vpop.permute.xlu1 %59  ;;  %v276_v51 = vpop.permute.xlu0 %275 }
  0xae   :  { %v68_v52 = vsel %vm65_vm2, %v58_v17, %v60_v50  ;;  %v288_v53 = vsel %vm287_vm6, %v276_v51, %v278_v39  ;;  %v357_v55 = vld [vmem:[#allocation2 + $0x80] sm:$0xff] }
  0xaf   :  { %78 = vst [vmem:[#allocation2 + $0x10] sm:$0xf0] %v68_v52  ;;  %298 = vst [vmem:[#allocation2 + $0x78] sm:$0xf0] %v288_v53  ;;  %v734_v56 = vpack.c.bf16 %v357_v55, %v352_v54 }
  0xb1   :  { %v97_v57 = vpop.permute.xlu1 %96  ;;  %v62_v58 = vpop.permute.xlu0 %61  ;;  %735 = vmatprep.subr.bf16.mxu0 %v734_v56  ;;  %v340_v56 = vld [vmem:[%s1028_s1] sm:$0xff] }
  0xb2   :  { %v105_v59 = vsel %vm102_vm0, %v944_v11, %v97_v57  ;;  %v69_v60 = vsel %vm65_vm2, %v60_v50, %v62_v58  ;;  %v351_v1 = vld [vmem:[#allocation2 + $0x50] sm:$0xff] }
  0xb3   :  { %115 = vst [vmem:[#allocation2 + $0x38] sm:$0xf] %v105_v59  ;;  %79 = vst [vmem:[#allocation2 + $0x18] sm:$0xf0] %v69_v60 }
  0xb5   :  { %v134_v61 = vpop.permute.xlu1 %133  ;;  %v99_v62 = vpop.permute.xlu0 %98 }
  0xb6   :  { %v142_v63 = vsel %vm139_vm1, %v948_v16, %v134_v61  ;;  %v106_v0 = vsel %vm102_vm0, %v97_v57, %v99_v62  ;;  %v356_v2 = vld [vmem:[#allocation2 + $0x78] sm:$0xff]  ;;  %v343_v21 = vld [vmem:[#allocation2 + $0x10] sm:$0xff] }
  0xb7   :  { %152 = vst [vmem:[#allocation2 + $0x38] sm:$0xf0] %v142_v63  ;;  %116 = vst [vmem:[#allocation2 + $0x40] sm:$0xf] %v106_v0  ;;  %v736_v3 = vpack.c.bf16 %v356_v2, %v351_v1 }
  0xb9   :  { %v171_v4 = vpop.permute.xlu1 %170  ;;  %v136_v5 = vpop.permute.xlu0 %135  ;;  %737 = vmatpush1.bf16.msra.mxu0 %v736_v3 }
  0xba   :  { %v179_v6 = vsel %vm176_vm3, %v169_v31, %v171_v4  ;;  %v143_v7 = vsel %vm139_vm1, %v134_v61, %v136_v5  ;;  %v344_v18 = vld [vmem:[#allocation2 + $0x18] sm:$0xff] }
  0xbb   :  { %189 = vst [vmem:[#allocation2 + $0x60] sm:$0xf] %v179_v6  ;;  %153 = vst [vmem:[#allocation2 + $0x40] sm:$0xf0] %v143_v7 }
  0xbd   :  { %v208_v8 = vpop.permute.xlu1 %207  ;;  %v173_v9 = vpop.permute.xlu0 %172 }
  0xbe   :  { %v216_v11 = vsel %vm213_vm4, %v206_v34, %v208_v8  ;;  %v180_v12 = vsel %vm176_vm3, %v171_v4, %v173_v9  ;;  %v348_v15 = vld [vmem:[#allocation2 + $0x38] sm:$0xff] }
  0xbf   :  { %226 = vst [vmem:[#allocation2 + $0x60] sm:$0xf0] %v216_v11  ;;  %190 = vst [vmem:[#allocation2 + $0x68] sm:$0xf] %v180_v12  ;;  %v740_v22 = vpack.c.bf16 %v348_v15, %v343_v21 }
  0xc1   :  { %v245_v13 = vpop.permute.xlu1 %244  ;;  %v210_v14 = vpop.permute.xlu0 %209 }
  0xc2   :  { %v253_v16 = vsel %vm250_vm5, %v243_v40, %v245_v13  ;;  %v217_v17 = vsel %vm213_vm4, %v208_v8, %v210_v14  ;;  %v349_v19 = vld [vmem:[#allocation2 + $0x40] sm:$0xff] }
  0xc3   :  { %263 = vst [vmem:[#allocation2 + $0x88] sm:$0xf] %v253_v16  ;;  %227 = vst [vmem:[#allocation2 + $0x68] sm:$0xf0] %v217_v17  ;;  %v738_v20 = vpack.c.bf16 %v349_v19, %v344_v18 }
  0xc5   :  { %v282_v23 = vpop.permute.xlu1 %281  ;;  %v247_v24 = vpop.permute.xlu0 %246  ;;  %739 = vmatprep.subr.bf16.mxu1 %v738_v20 }
  0xc6   :  { %v290_v25 = vsel %vm287_vm6, %v959_v43, %v282_v23  ;;  %v254_v26 = vsel %vm250_vm5, %v245_v13, %v247_v24  ;;  %741 = vmatpush1.bf16.msra.mxu1 %v740_v22  ;;  %v353_v42 = vld [vmem:[#allocation2 + $0x60] sm:$0xff] }
  0xc7   :  { %300 = vst [vmem:[#allocation2 + $0x88] sm:$0xf0] %v290_v25  ;;  %264 = vst [vmem:[#allocation2 + $0x90] sm:$0xf] %v254_v26  ;;  %v598_v13 = vld [vmem:[%s1030_s3] sm:$0x1f] }
  0xc9   :  { %v315_v27 = vpop.permute.xlu1 %314  ;;  %v284_v28 = vpop.permute.xlu0 %283 }
  0xca   :  { %v291_v29 = vsel %vm287_vm6, %v282_v23, %v284_v28  ;;  %v354_v39 = vld [vmem:[#allocation2 + $0x68] sm:$0xff] }
  0xcb   :  { %301 = vst [vmem:[#allocation2 + $0x90] sm:$0xf0] %v291_v29 }
  0xcd   :  { %v64_v30 = vpop.permute.xlu1 %63  ;;  %v317_v31 = vpop.permute.xlu0 %316 }
  0xce   :  { %v70_v32 = vsel %vm65_vm2, %v62_v58, %v64_v30  ;;  %v326_v33 = vsel %vm324_vm7, %v315_v27, %v317_v31  ;;  %v358_v36 = vld [vmem:[#allocation2 + $0x88] sm:$0xff] }
  0xcf   :  { %80 = vst [vmem:[#allocation2 + $0x20] sm:$0xf0] %v70_v32  ;;  %336 = vst [vmem:[#allocation2 + $0xa8] sm:$0xf] %v326_v33  ;;  %v744_v43 = vpack.c.bf16 %v358_v36, %v353_v42 }
  0xd1   :  { %v138_v34 = vpop.permute.xlu1 %137  ;;  %v101_v35 = vpop.permute.xlu0 %100 }
  0xd2   :  { %v144_v37 = vsel %vm139_vm1, %v136_v5, %v138_v34  ;;  %v107_v38 = vsel %vm102_vm0, %v99_v62, %v101_v35  ;;  %v359_v40 = vld [vmem:[#allocation2 + $0x90] sm:$0xff]  ;;  %v836_v62 = vmov 0.0|0.0  }
  0xd3   :  { %154 = vst [vmem:[#allocation2 + $0x48] sm:$0xf0] %v144_v37  ;;  %117 = vst [vmem:[#allocation2 + $0x48] sm:$0xf] %v107_v38  ;;  %v742_v41 = vpack.c.bf16 %v359_v40, %v354_v39 }
  0xd5   :  { %v175_v44 = vpop.permute.xlu1 %174  ;;  %v313_v45 = vpop.permute.xlu0 %312  ;;  %743 = vmatprep.subr.bf16.mxu1 %v742_v41 }
  0xd6   :  { %v181_v46 = vsel %vm176_vm3, %v173_v9, %v175_v44  ;;  %v325_v47 = vsel %vm324_vm7, %v313_v45, %v315_v27  ;;  %745 = vmatpush1.bf16.msra.mxu1 %v744_v43  ;;  %v362_v48 = vld [vmem:[#allocation2 + $0xa8] sm:$0xf]  ;;  %v345_v60 = vld [vmem:[#allocation2 + $0x20] sm:$0xff]  ;;  %v600_v9 = vlaneseq }
  0xd7   :  { %191 = vst [vmem:[#allocation2 + $0x70] sm:$0xf] %v181_v46  ;;  %335 = vst [vmem:[#allocation2 + $0xa0] sm:$0xf] %v325_v47  ;;  %703 = vmatprep.subr.msk.mxu0 %vm370_vm8, %v362_v48 }
  0xd8   :  { %v601_v11 = vshrl.u32 %v600_v9, 7 }
  0xd9   :  { %v249_v49 = vpop.permute.xlu1 %248  ;;  %v212_v50 = vpop.permute.xlu0 %211 }
  0xda   :  { %v255_v51 = vsel %vm250_vm5, %v247_v24, %v249_v49  ;;  %v218_v52 = vsel %vm213_vm4, %v210_v14, %v212_v50  ;;  %v350_v53 = vld [vmem:[#allocation2 + $0x48] sm:$0xff]  ;;  %v602_v12 = vsub.s32 0, %v601_v11  ;;  %v610_v21 = vsub.s32 2, %v601_v11 }
  0xdb   :  { %265 = vst [vmem:[#allocation2 + $0x98] sm:$0xf] %v255_v51  ;;  %228 = vst [vmem:[#allocation2 + $0x70] sm:$0xf0] %v218_v52  ;;  %v747_v61 = vpack.c.bf16 %v350_v53, %v345_v60  ;;  %v614_v22 = vsub.s32 3, %v601_v11  ;;  %v618_v23 = vsub.s32 4, %v601_v11 }
  0xdc   :  { %v603_v14 = vrot.slane %v598_v13, %v602_v12  ;;  %v611_v24 = vrot.slane %v598_v13, %v610_v21  ;;  %v839_v60 = vmov 1  }
  0xdd   :  { %v319_v54 = vpop.permute.xlu1 %318  ;;  %v286_v55 = vpop.permute.xlu0 %285  ;;  %v615_v25 = vrot.slane %v598_v13, %v614_v22  ;;  %v619_v26 = vrot.slane %v598_v13, %v618_v23  ;;  %768 = vset.pattern.permute.xlu1 %v839_v60 }
  0xde   :  { %v327_v57 = vsel %vm324_vm7, %v317_v31, %v319_v54  ;;  %v292_v58 = vsel %vm287_vm6, %v284_v28, %v286_v55  ;;  %v361_v59 = vld [vmem:[#allocation2 + $0xa0] sm:$0xf] }
  0xdf   :  { %337 = vst [vmem:[#allocation2 + $0xb0] sm:$0xf] %v327_v57  ;;  %302 = vst [vmem:[#allocation2 + $0x98] sm:$0xf0] %v292_v58  ;;  %704 = vmatpush1.msk.msra.mxu0 %vm370_vm8, %v361_v59  ;;  %v838_v58 = vmov 0   ;;  %v659_v59 = vld [vmem:[%s1029_s2] sm:$0xff] }
  0xe0   :  { %746 = vmatprep.subr.bf16.mxu0 %v836_v62  ;;  %705 = vmatmul.mubr.msk.f32.vlgmr.msra.gmra.mrb[0].mxu0 %vm366_vm9, %v340_v56  ;;  %s800_s2 = scalar_lea.vmem %s695_s13, 640 }
  0xe1   :  { %v323_v63 = vpop.permute.xlu1 %322  ;;  %v321_v0 = vpop.permute.xlu0 %320  ;;  %748 = vmatpush3.bf16.msra.mxu0 %v747_v61  ;;  %727 = vmatprep.mubr.msk.f32.mxu0 %vm837_vm10, %v835_v10  ;;  %p801_p8 = scmp.ne.s32.totalorder %s695_s13, %s800_s2  ;;  %p806_p10 = scmp.lt.s32.totalorder %s800_s2, %s800_s2 }
  0xe2   :  { %v328_v1 = vsel %vm324_vm7, %v319_v54, %v321_v0  ;;  %v329_v2 = vsel %vm324_vm7, %v321_v0, %v323_v63  ;;  %749 = vmatprep.subr.bf16.mxu0 %v836_v62  ;;  %v355_v3 = vld [vmem:[#allocation2 + $0x70] sm:$0xff]  ;;  %767 = vset.pattern.permute.xlu0 %v838_v58 }
  0xe3   :  { %338 = vst [vmem:[#allocation2 + $0xb8] sm:$0xf] %v328_v1  ;;  %339 = vst [vmem:[#allocation2 + $0xc0] sm:$0xf] %v329_v2  ;;  %p807_p11 = por %p806_p10, %p805_p9 }
  0xe5   :  { %p808_p12 = pnand %p807_p11, %p801_p8 }
  0xe6   :  { %v360_v4 = vld [vmem:[#allocation2 + $0x98] sm:$0xff]  ;;  %v363_v7 = vld [vmem:[#allocation2 + $0xb0] sm:$0xf] }
  0xe7   :  { %v750_v5 = vpack.c.bf16 %v360_v4, %v355_v3 }
  0xe9   :  { %751 = vmatpush3.bf16.msra.mxu0 %v750_v5 }
  0xea   :  { %v364_v6 = vld [vmem:[#allocation2 + $0xb8] sm:$0xf]  ;;  %725 = vmatprep.subr.mxu0 %v835_v10  ;;  %v365_v8 = vld [vmem:[#allocation2 + $0xc0] sm:$0xf]  ;;  %v606_v10 = vsub.s32 1, %v601_v11 }
  0xeb   :  { %706 = vmatprep.subr.msk.mxu1 %vm370_vm8, %v364_v6 }
  0xec   :  { %707 = vmatpush1.msk.msra.mxu1 %vm370_vm8, %v363_v7  ;;  %v607_v15 = vrot.slane %v598_v13, %v606_v10 }
  0xed   :  { %708 = vmatmul.mubr.msk.f32.vlgmr.msra.gmra.mrb[0].mxu1 %vm366_vm9, %v340_v56  ;;  %726 = vmatpush3.msk.msra.mxu0 %vm370_vm8, %v365_v8 }
  0xee   :  { %728 = vmatmul.mubr.msk.f32.vlgmr.msra.gmra.mrb[2].mxu0 %vm366_vm9, %v340_v56 }
 0x1b3   :  { %v452_v16 = vpop.f32.mrb[0].mxu0 }
 0x1b4   :  { %v625_v17 = vmul.f32 %v603_v14, %v452_v16  ;;  %v454_v18 = vpop.f32.mrb[1].mxu0 }
 0x1b5   :  { %v626_v19 = vmul.f32 %v607_v15, %v454_v18 }
 0x1b7   :  { %v630_v20 = vadd.f32 %v626_v19, %v625_v17 }
 0x1c0   :  { %v523_v27 = vpop.f32.mrb[0].mxu1 }
 0x1c1   :  { %v627_v28 = vmul.f32 %v611_v24, %v523_v27  ;;  %v525_v29 = vpop.f32.mrb[1].mxu1  ;;  %v594_v30 = vpop.f32.mrb[2].mxu0 }
 0x1c2   :  { %v628_v31 = vmul.f32 %v615_v25, %v525_v29  ;;  %v729_v32 = vpop.f32.mrb[3].mxu0  ;;  %v629_v34 = vmul.f32 %v619_v26, %v594_v30 }
 0x1c3   :  { %v631_v33 = vadd.f32 %v630_v20, %v627_v28 }
 0x1c5   :  { %v632_v35 = vadd.f32 %v631_v33, %v628_v31 }
 0x1c7   :  { %v633_v36 = vadd.f32 %v632_v35, %v629_v34 }
 0x1c9   :  { %634 = vadd.xlane.f32.xlu0 %v633_v36 }
 0x256   :  { %v635_v37 = vpop.xlane.xlu0 %634 }
 0x257   :  { %v636_v38 = vmul.f32 0.001953125, %v635_v37 }
 0x259   :  { %v637_v39 = vsub.f32 %v452_v16, %v636_v38  ;;  %v638_v40 = vsub.f32 %v454_v18, %v636_v38  ;;  %v639_v41 = vsub.f32 %v523_v27, %v636_v38  ;;  %v640_v42 = vsub.f32 %v525_v29, %v636_v38 }
 0x25a   :  { %v641_v43 = vsub.f32 %v594_v30, %v636_v38 }
 0x25b   :  { %v642_v44 = vmul.f32 %v637_v39, %v637_v39  ;;  %v643_v45 = vmul.f32 %v638_v40, %v638_v40  ;;  %v644_v46 = vmul.f32 %v639_v41, %v639_v41  ;;  %v645_v47 = vmul.f32 %v640_v42, %v640_v42 }
 0x25c   :  { %v646_v50 = vmul.f32 %v641_v43, %v641_v43 }
 0x25d   :  { %v647_v48 = vmul.f32 %v642_v44, %v603_v14  ;;  %v648_v49 = vmul.f32 %v643_v45, %v607_v15  ;;  %v649_v51 = vmul.f32 %v644_v46, %v611_v24  ;;  %v650_v53 = vmul.f32 %v645_v47, %v615_v25 }
 0x25e   :  { %v651_v55 = vmul.f32 %v646_v50, %v619_v26 }
 0x25f   :  { %v652_v52 = vadd.f32 %v648_v49, %v647_v48 }
 0x261   :  { %v653_v54 = vadd.f32 %v652_v52, %v649_v51 }
 0x263   :  { %v654_v56 = vadd.f32 %v653_v54, %v650_v53 }
 0x265   :  { %v655_v57 = vadd.f32 %v654_v56, %v651_v55 }
 0x267   :  { %656 = vadd.xlane.f32.xlu1 %v655_v57 }
 0x278   :  { %675 = vperm.xlu1 %768, %v659_v59  }
 0x2f4   :  { %v657_v61 = vpop.xlane.xlu1 %656 }
 0x2f5   :  { %v658_v62 = vmul.f32 0.001953125, %v657_v61 }
 0x2f7   :  { %v660_v63 = vadd.f32 1e-05, %v658_v62 }
 0x2f8   :  { %v676_v3 = vpop.permute.xlu1 %675 }
 0x2f9   :  { %776 = vrsqrt.f32 %v660_v63 }
 0x303   :  { %v777_v0 = vpop.eup %776 }
 0x304   :  { %v662_v1 = vmul.f32 %v777_v0, %v659_v59 }
 0x306   :  { %665 = vperm.xlu0 %767, %v662_v1  }
 0x30a   :  { %769 = vset.pattern.permute.xlu0 %v839_v60 }
 0x385   :  { %v666_v2 = vpop.permute.xlu0 %665 }
 0x386   :  { %v668_v4 = vmul.f32 %v666_v2, %v637_v39  ;;  %v669_v5 = vmul.f32 %v666_v2, %v638_v40  ;;  %v670_v6 = vmul.f32 %v666_v2, %v639_v41  ;;  %v671_v7 = vmul.f32 %v666_v2, %v640_v42 }
 0x387   :  { %v672_v8 = vmul.f32 %v666_v2, %v641_v43 }
 0x388   :  { %v678_v9 = vadd.f32 %v676_v3, %v668_v4  ;;  %v679_v11 = vadd.f32 %v676_v3, %v669_v5  ;;  %v680_v12 = vadd.f32 %v676_v3, %v670_v6  ;;  %v681_v13 = vadd.f32 %v676_v3, %v671_v7 }
 0x389   :  { %v682_v10 = vadd.f32 %v676_v3, %v672_v8 }
 0x38a   :  { %683 = vst [vmem:[#allocation6] sm:$0xff] %v678_v9  ;;  %684 = vst [vmem:[#allocation6 + $0x8] sm:$0xff] %v679_v11 }
 0x38b   :  { %685 = vst [vmem:[#allocation6 + $0x10] sm:$0xff] %v680_v12  ;;  %686 = vst [vmem:[#allocation6 + $0x18] sm:$0xff] %v681_v13 }
 0x38c   :  { %687 = vst [vmem:[#allocation6 + $0x20] sm:$0xff] %v682_v10 }
 0x38d   :  { %811 = shalt.err (!%p808_p12)
}
 0x38e   :  { %s812_s16 = scalar_lea.hbm %s1031_s4, 640 }
 0x38f   :  { %p813_p13 = scmp.ne.s32.totalorder %s1031_s4, %s812_s16  ;;  %p816_p0 = scmp.lt.u32.totalorder %s812_s16, %s1031_s4 }
 0x391   :  { %p818_p1 = pnand %p816_p0, %p813_p13 }
 0x393   :  { %821 = shalt.err (!%p818_p1)
}
 0x394   :  { %697 = dma.vmem_to_hbm [thread:$0]  %s695_s13, 640, %s1031_s4, [#allocation5]  }
 0x395   :  { %824 = dma.done.wait [#allocation5], 640  }
 0x396   :  { %825 = vsyncadd [#allocation5], 4294966656 }
 0x397   :  { %701 = vsyncpa [#allocation4], 1 }
 0x398   :  { %702 = vsyncpa [#allocation5], 1 }

</bundles_post_ra>
